<compile_context>
chip_gen: v6e
topology: v6e:2x2x1
jax: 0.10.0
libtpu: 0.0.40
codegen_flags: <defaults>
</compile_context>

<pallas_src>
import math

import jax
import jax.numpy as jnp
import numpy as np
from jax import lax
from jax.experimental import pallas as pl
from jax.experimental.pallas import tpu as pltpu


# ----------------------------- Pallas kernel --------------------------------
def _attn_kernel(patches_ref, feat_ref, w3_ref, b3_ref, wb_ref, out_ref):
    # patches_ref: (1, 9*Cm, R) bf16   im2col of the resized soft mask (transposed)
    # feat_ref   : (1, Cf,   R) bf16   FPN feature, channels x pixels
    # w3_ref     : (1, Cs, 9*Cm) bf16  3x3 conv weights (row = out ch)
    # b3_ref     : (1, Cs, 1)  f32     3x3 conv bias
    # wb_ref     : (1, Cb, Cs+Cf) bf16 bottleneck 1x1 weights ([conv | feat] order)
    # out_ref    : (1, Cb, R)  f32
    # 3x3 "same" conv as a single K=9*Cm matmul on the MXU (f32 accumulation).
    conv = jnp.dot(w3_ref[0], patches_ref[0],
                   preferred_element_type=jnp.float32)          # (Cs, R)
    conv = jnp.maximum(conv + b3_ref[0], 0.0)                   # bias + ReLU in f32

    # concat((relu_out, feature), channel) + 1x1 conv (no bias) as ONE K=Cs+Cf dot.
    cat = jnp.concatenate([conv.astype(jnp.bfloat16), feat_ref[0]], axis=0)
    bott = jnp.dot(wb_ref[0], cat, preferred_element_type=jnp.float32)  # (Cb, R)
    out_ref[0] = jnp.maximum(bott, 0.0)


def _fused_attention_call(patches_all, feat_all, w3_all, b3_all, wb_all, Cb):
    K, Kc, R = patches_all.shape          # keys, 9*Cm, padded rows (lane-dense)
    Cf = feat_all.shape[1]
    Cs = w3_all.shape[1]
    return pl.pallas_call(
        _attn_kernel,
        out_shape=jax.ShapeDtypeStruct((K, Cb, R), jnp.float32),
        grid_spec=pltpu.PrefetchScalarGridSpec(
            num_scalar_prefetch=0,
            grid=(K,),
            in_specs=[
                pl.BlockSpec((1, Kc, R), lambda k: (k, 0, 0)),
                pl.BlockSpec((1, Cf, R), lambda k: (k, 0, 0)),
                pl.BlockSpec((1, Cs, Kc), lambda k: (k, 0, 0)),
                pl.BlockSpec((1, Cs, 1), lambda k: (k, 0, 0)),
                pl.BlockSpec((1, Cb, Cs + Cf), lambda k: (k, 0, 0)),
            ],
            out_specs=pl.BlockSpec((1, Cb, R), lambda k: (k, 0, 0)),
        ),
        compiler_params=pltpu.CompilerParams(
            dimension_semantics=("parallel",)),   # keys are independent -> both TCs on v7x
    )(patches_all, feat_all, w3_all, b3_all, wb_all)


# ------------------------------ glue helpers ---------------------------------
def _resize_nearest_nchw(mask, out_h, out_w):
    """F.interpolate(mask.float(), size) with default mode='nearest'."""
    _, _, Hin, Win = mask.shape
    mask = mask.astype(jnp.float32)
    if Hin % out_h == 0 and Win % out_w == 0:
        # integer ratio -> pure strided slice, no gather
        return mask[:, :, :: Hin // out_h, :: Win // out_w]
    # exact integer floor(i * Hin / out) (avoids float-scale off-by-one)
    rows = (jnp.arange(out_h) * Hin) // out_h
    cols = (jnp.arange(out_w) * Win) // out_w
    return mask[:, :, rows[:, None], cols[None, :]]


def _im2col_t(mask_r):
    """(B, Cm, H, W) -> (9*Cm, B*H*W); column index = pixel, row = (dy*3+dx)*Cm + c."""
    B, Cm, H, W = mask_r.shape
    mp = jnp.pad(mask_r, ((0, 0), (0, 0), (1, 1), (1, 1)))
    shifts = [mp[:, :, dy:dy + H, dx:dx + W]
              for dy in range(3) for dx in range(3)]
    p = jnp.stack(shifts, axis=0)                 # (9, B, Cm, H, W)
    p = jnp.transpose(p, (0, 2, 1, 3, 4))         # (9, Cm, B, H, W)
    return p.reshape(9 * Cm, B * H * W)


# ------------------------------ module ---------------------------------------
class SoftAttentionMechanismVRBPallas:
    def __init__(self, key, FPN_filters=32, mask_mold_filters=8,
                 soft_attention_filters=32, bottleneck_filters=16,
                 keys=("0", "1", "2", "3", "pool")):
        self.keys = list(keys)
        self.Cf = FPN_filters
        self.Cm = mask_mold_filters
        self.Cs = soft_attention_filters
        self.Cb = bottleneck_filters

        self.params = {}
        for k in self.keys:
            key, k1, k2, k3 = jax.random.split(key, 4)
            w_conv = jax.random.normal(k1, (self.Cs, self.Cm, 3, 3),
                                       jnp.float32) * 0.05
            b_conv = jax.random.normal(k2, (self.Cs,), jnp.float32) * 0.05
            w_bott = jax.random.normal(k3, (self.Cb, self.Cs + self.Cf, 1, 1),
                                       jnp.float32) * 0.05
            self.params[k] = dict(w_conv=w_conv, b_conv=b_conv, w_bott=w_bott)

        # Stack per-key weights into kernel layouts once (bf16 MXU operands).
        w3_t, b3, wb_t = [], [], []
        for k in self.keys:
            p = self.params[k]
            # w3_t[o, (dy*3+dx)*Cm + c] = w_conv[o, c, dy, dx]
            w3_t.append(jnp.transpose(p["w_conv"], (0, 2, 3, 1))
                        .reshape(self.Cs, 9 * self.Cm))
            b3.append(p["b_conv"].reshape(self.Cs, 1))
            wb_t.append(p["w_bott"][:, :, 0, 0])          # (Cb, Cs+Cf)
        self.w3_all = jnp.stack(w3_t).astype(jnp.bfloat16)   # (K, Cs, 9*Cm)
        self.b3_all = jnp.stack(b3).astype(jnp.float32)      # (K, Cs, 1)
        self.wb_all = jnp.stack(wb_t).astype(jnp.bfloat16)   # (K, Cb, Cs+Cf)

        self._forward_jit = jax.jit(self._forward)

    def __call__(self, features, soft_mask_input, targets=None):
        # features: dict key -> [B, Cf, H, W] (NCHW);  soft_mask_input: [B, Cm, Hm, Wm]
        return self._forward_jit(features, soft_mask_input), targets

    def _forward(self, features, soft_mask_input):
        B = soft_mask_input.shape[0]
        shapes = {k: features[k].shape[-2:] for k in self.keys}
        rows = {k: B * shapes[k][0] * shapes[k][1] for k in self.keys}
        # one lane-dense row slab shared by all keys (padded with zeros)
        R = max(128, int(math.ceil(max(rows.values()) / 128)) * 128)

        patches, feats = [], []
        for k in self.keys:
            H, W = shapes[k]
            mask_r = _resize_nearest_nchw(soft_mask_input, H, W)
            pt = _im2col_t(mask_r)                                       # (9*Cm, r)
            ft = jnp.transpose(features[k], (1, 0, 2, 3)) \
                    .reshape(self.Cf, rows[k]).astype(jnp.float32)       # (Cf, r)
            patches.append(jnp.pad(pt, ((0, 0), (0, R - rows[k]))))
            feats.append(jnp.pad(ft, ((0, 0), (0, R - rows[k]))))
        patches_all = jnp.stack(patches).astype(jnp.bfloat16)            # (K, 9*Cm, R)
        feat_all = jnp.stack(feats).astype(jnp.bfloat16)                 # (K, Cf, R)

        out_all = _fused_attention_call(patches_all, feat_all,
                                        self.w3_all, self.b3_all,
                                        self.wb_all, self.Cb)            # (K, Cb, R)

        out = {}
        for i, k in enumerate(self.keys):
            H, W = shapes[k]
            o = out_all[i, :, :rows[k]].reshape(self.Cb, B, H, W)
            out[k] = jnp.transpose(o, (1, 0, 2, 3))                      # NCHW
        return out

    # -------- pure-JAX reference (same bf16-operand rounding, f32 accum) -----
    def reference(self, features, soft_mask_input):
        out = {}
        for k in self.keys:
            f = features[k]
            H, W = f.shape[-2:]
            p = self.params[k]
            mask_r = _resize_nearest_nchw(soft_mask_input, H, W)
            mask_b = mask_r.astype(jnp.bfloat16).astype(jnp.float32)
            w_conv = p["w_conv"].astype(jnp.bfloat16).astype(jnp.float32)
            conv = lax.conv_general_dilated(
                jnp.transpose(mask_b, (0, 2, 3, 1)),
                jnp.transpose(w_conv, (2, 3, 1, 0)),
                window_strides=(1, 1), padding=((1, 1), (1, 1)),
                dimension_numbers=("NHWC", "HWIO", "NHWC"),
                precision=lax.Precision.HIGHEST)
            conv = jnp.maximum(conv + p["b_conv"], 0.0)
            conv = conv.astype(jnp.bfloat16).astype(jnp.float32)
            feat = jnp.transpose(f, (0, 2, 3, 1)) \
                      .astype(jnp.bfloat16).astype(jnp.float32)
            cat = jnp.concatenate([conv, feat], axis=-1)
            wb = jnp.transpose(p["w_bott"][:, :, 0, 0], (1, 0)) \
                    .astype(jnp.bfloat16).astype(jnp.float32)
            o = jnp.maximum(jnp.einsum("bhwc,cd->bhwd", cat, wb,
                                       precision=lax.Precision.HIGHEST), 0.0)
            out[k] = jnp.transpose(o, (0, 3, 1, 2))
        return out


# --------------------------------- main ---------------------------------------
if __name__ == "__main__":
    root = jax.random.PRNGKey(0)
    k_model, k_mask, *k_feats = jax.random.split(root, 8)

    B = 2
    Cf, Cm = 32, 8
    spatial = {"0": 16, "1": 8, "2": 8, "3": 4, "pool": 4}

    model = SoftAttentionMechanismVRBPallas(
        k_model, FPN_filters=Cf, mask_mold_filters=Cm,
        soft_attention_filters=32, bottleneck_filters=16,
        keys=list(spatial.keys()))

    features = {
        k: jax.random.normal(kk, (B, Cf, s, s), jnp.float32)
        for (k, s), kk in zip(spatial.items(), k_feats)
    }
    soft_mask_input = jax.random.normal(k_mask, (B, Cm, 32, 32), jnp.float32)

    out, tgt = model(features, soft_mask_input, targets=None)
    out = jax.tree_util.tree_map(jax.block_until_ready, out)

    ref = model.reference(features, soft_mask_input)
    for k in spatial:
        assert out[k].shape == (B, 16, spatial[k], spatial[k]), out[k].shape
        np.testing.assert_allclose(np.asarray(out[k]), np.asarray(ref[k]),
                                   rtol=2e-3, atol=2e-3)

    print("KERNEL_OK")
</pallas_src>

<mosaic_0001>
module attributes {stable_mosaic.version = 11 : i64} {
  func.func @_attn_kernel(%arg0: i32, %arg1: memref<1x72x512xbf16, #tpu.memory_space<vmem>>, %arg2: memref<1x32x512xbf16, #tpu.memory_space<vmem>>, %arg3: memref<1x32x72xbf16, #tpu.memory_space<vmem>>, %arg4: memref<1x32x1xf32, #tpu.memory_space<vmem>>, %arg5: memref<1x16x64xbf16, #tpu.memory_space<vmem>>, %arg6: memref<1x16x512xf32, #tpu.memory_space<vmem>>) attributes {dimension_semantics = [#tpu.dimension_semantics<parallel>], iteration_bounds = array<i64: 5>, scalar_prefetch = 0 : i64, scratch_operands = 0 : i64, tpu.core_type = #tpu.core_type<tc>, window_params = [{transform_indices = @transform_0, window_bounds = array<i64: 1, 72, 512>}, {transform_indices = @transform_1, window_bounds = array<i64: 1, 32, 512>}, {transform_indices = @transform_2, window_bounds = array<i64: 1, 32, 72>}, {transform_indices = @transform_3, window_bounds = array<i64: 1, 32, 1>}, {transform_indices = @transform_4, window_bounds = array<i64: 1, 16, 64>}, {transform_indices = @transform_5, window_bounds = array<i64: 1, 16, 512>}]} {
    %c0 = arith.constant 0 : index
    %c0_0 = arith.constant 0 : index
    %c0_1 = arith.constant 0 : index
    %0 = vector.load %arg3[%c0, %c0_0, %c0_1] : memref<1x32x72xbf16, #tpu.memory_space<vmem>>, vector<1x32x72xbf16>
    %1 = vector.shape_cast %0 : vector<1x32x72xbf16> to vector<32x72xbf16>
    %c0_2 = arith.constant 0 : index
    %c0_3 = arith.constant 0 : index
    %c0_4 = arith.constant 0 : index
    %2 = vector.load %arg1[%c0_2, %c0_3, %c0_4] : memref<1x72x512xbf16, #tpu.memory_space<vmem>>, vector<1x72x512xbf16>
    %3 = vector.shape_cast %2 : vector<1x72x512xbf16> to vector<72x512xbf16>
    %cst = arith.constant dense<0.000000e+00> : vector<32x512xf32>
    %4 = tpu.matmul %1, %3, %cst {dimension_numbers = #tpu.dot_dimension_numbers<[1], [0], [0], [1], [0, 0, 1, 1], [], []>} : vector<32x72xbf16>, vector<72x512xbf16>, vector<32x512xf32> -> vector<32x512xf32>
    %c0_5 = arith.constant 0 : index
    %c0_6 = arith.constant 0 : index
    %c0_7 = arith.constant 0 : index
    %5 = vector.load %arg4[%c0_5, %c0_6, %c0_7] : memref<1x32x1xf32, #tpu.memory_space<vmem>>, vector<1x32x1xf32>
    %6 = vector.shape_cast %5 : vector<1x32x1xf32> to vector<32x1xf32>
    %7 = vector.broadcast %6 : vector<32x1xf32> to vector<32x512xf32>
    %8 = arith.addf %4, %7 : vector<32x512xf32>
    %cst_8 = arith.constant 0.000000e+00 : f32
    %9 = vector.broadcast %cst_8 : f32 to vector<32x512xf32>
    %10 = arith.maximumf %8, %9 : vector<32x512xf32>
    %11 = arith.truncf %10 : vector<32x512xf32> to vector<32x512xbf16>
    %c0_9 = arith.constant 0 : index
    %c0_10 = arith.constant 0 : index
    %c0_11 = arith.constant 0 : index
    %12 = vector.load %arg2[%c0_9, %c0_10, %c0_11] : memref<1x32x512xbf16, #tpu.memory_space<vmem>>, vector<1x32x512xbf16>
    %13 = vector.shape_cast %12 : vector<1x32x512xbf16> to vector<32x512xbf16>
    %14 = tpu.concatenate %11, %13 in 0 : vector<32x512xbf16>, vector<32x512xbf16> -> vector<64x512xbf16>
    %c0_12 = arith.constant 0 : index
    %c0_13 = arith.constant 0 : index
    %c0_14 = arith.constant 0 : index
    %15 = vector.load %arg5[%c0_12, %c0_13, %c0_14] : memref<1x16x64xbf16, #tpu.memory_space<vmem>>, vector<1x16x64xbf16>
    %16 = vector.shape_cast %15 : vector<1x16x64xbf16> to vector<16x64xbf16>
    %cst_15 = arith.constant dense<0.000000e+00> : vector<16x512xf32>
    %17 = tpu.matmul %16, %14, %cst_15 {dimension_numbers = #tpu.dot_dimension_numbers<[1], [0], [0], [1], [0, 0, 1, 1], [], []>} : vector<16x64xbf16>, vector<64x512xbf16>, vector<16x512xf32> -> vector<16x512xf32>
    %cst_16 = arith.constant 0.000000e+00 : f32
    %18 = vector.broadcast %cst_16 : f32 to vector<16x512xf32>
    %19 = arith.maximumf %17, %18 : vector<16x512xf32>
    %c0_17 = arith.constant 0 : index
    %c0_18 = arith.constant 0 : index
    %c0_19 = arith.constant 0 : index
    %20 = vector.load %arg6[%c0_17, %c0_18, %c0_19] : memref<1x16x512xf32, #tpu.memory_space<vmem>>, vector<1x16x512xf32>
    %21 = vector.shape_cast %20 : vector<1x16x512xf32> to vector<16x512xf32>
    %22 = vector.shape_cast %19 : vector<16x512xf32> to vector<1x16x512xf32>
    tpu.vector_store %arg6[%c0_17, %c0_18, %c0_19], %22 {strides = array<i32>} : memref<1x16x512xf32, #tpu.memory_space<vmem>>, vector<1x16x512xf32>,
    return
  }
  func.func @transform_0(%arg0: i32) -> (i32, i32, i32) {
    %c0_i32 = arith.constant 0 : i32
    %c0_i32_0 = arith.constant 0 : i32
    %c0_i32_1 = arith.constant 0 : i32
    return %arg0, %c0_i32, %c0_i32_0 : i32, i32, i32
  }
  func.func @transform_1(%arg0: i32) -> (i32, i32, i32) {
    %c0_i32 = arith.constant 0 : i32
    %c0_i32_0 = arith.constant 0 : i32
    %c0_i32_1 = arith.constant 0 : i32
    return %arg0, %c0_i32, %c0_i32_0 : i32, i32, i32
  }
  func.func @transform_2(%arg0: i32) -> (i32, i32, i32) {
    %c0_i32 = arith.constant 0 : i32
    %c0_i32_0 = arith.constant 0 : i32
    %c0_i32_1 = arith.constant 0 : i32
    return %arg0, %c0_i32, %c0_i32_0 : i32, i32, i32
  }
  func.func @transform_3(%arg0: i32) -> (i32, i32, i32) {
    %c0_i32 = arith.constant 0 : i32
    %c0_i32_0 = arith.constant 0 : i32
    %c0_i32_1 = arith.constant 0 : i32
    return %arg0, %c0_i32, %c0_i32_0 : i32, i32, i32
  }
  func.func @transform_4(%arg0: i32) -> (i32, i32, i32) {
    %c0_i32 = arith.constant 0 : i32
    %c0_i32_0 = arith.constant 0 : i32
    %c0_i32_1 = arith.constant 0 : i32
    return %arg0, %c0_i32, %c0_i32_0 : i32, i32, i32
  }
  func.func @transform_5(%arg0: i32) -> (i32, i32, i32) {
    %c0_i32 = arith.constant 0 : i32
    %c0_i32_0 = arith.constant 0 : i32
    %c0_i32_1 = arith.constant 0 : i32
    return %arg0, %c0_i32, %c0_i32_0 : i32, i32, i32
  }
}

</mosaic_0001>

<bundles_post_ra>
// kernel: squeeze.5
= control target key start
LH: loop header
LB: loop body
LE: loop exit
PB: predicated region body
PF: predicated region fallthrough
CT: control target
= control target key end

     0   :  { %vm155_vm0 = vcmask 1047556   ;;  %s1167_s14 = smov 112   ;;  %s1168_s26 = smov 96   ;;  %vm3_vm1 = vcmask 130048   ;;  %s2405_s0 = inlined_call_operand.vmem [shape: f32[1,16,512], index: 0, kind: input, shape index: {}]   ;;  %s2406_s1 = inlined_call_operand.vmem [shape: f32[16,2,16,16], index: 1, kind: output, shape index: {}]  }
   0x1   :  { %v950_v0 = vld [vmem:[%s2405_s0 + $0x4] ss:$8 sm:$0xf]   ;;  %v951_v1 = vld [vmem:[%s2405_s0 - $0x1b] ss:$8 sm:$0xf0]  }
   0x2   :  { %v182_v2 = vsel %vm155_vm0, %v951_v1, %v950_v0  ;;  %v152_v3 = vld [vmem:[%s2405_s0] ss:$8 sm:$0xf]   ;;  %v943_v4 = vld [vmem:[%s2405_s0 - $0x1f] ss:$8 sm:$0xf0]  }
   0x3   :  { %183 = vrot.lane.b32.xlu1 %v182_v2, %s1167_s14  ;;  %v156_v5 = vsel %vm155_vm0, %v943_v4, %v152_v3  ;;  %v954_v6 = vld [vmem:[%s2405_s0 + $0x6] ss:$8 sm:$0xf]   ;;  %v955_v7 = vld [vmem:[%s2405_s0 - $0x19] ss:$8 sm:$0xf0]  }
   0x4   :  { %157 = vrot.lane.b32.xlu0 %v156_v5, %s1167_s14  ;;  %v195_v8 = vsel %vm155_vm0, %v955_v7, %v954_v6  ;;  %v946_v9 = vld [vmem:[%s2405_s0 + $0x2] ss:$8 sm:$0xf]   ;;  %v947_v10 = vld [vmem:[%s2405_s0 - $0x1d] ss:$8 sm:$0xf0]  }
   0x5   :  { %v169_v11 = vsel %vm155_vm0, %v947_v10, %v946_v9  ;;  %v962_v12 = vld [vmem:[%s2405_s0 + $0x22] ss:$8 sm:$0xf]   ;;  %v963_v13 = vld [vmem:[%s2405_s0 + $0x3] ss:$8 sm:$0xf0]  }
   0x6   :  { %v958_v14 = vld [vmem:[%s2405_s0 + $0x20] ss:$8 sm:$0xf]   ;;  %v959_v15 = vld [vmem:[%s2405_s0 + $0x1] ss:$8 sm:$0xf0]   ;;  %v221_v16 = vsel %vm155_vm0, %v963_v13, %v962_v12 }
   0x7   :  { %196 = vrot.lane.b32.xlu1 %v195_v8, %s1167_s14  ;;  %v208_v17 = vsel %vm155_vm0, %v959_v15, %v958_v14  ;;  %v970_v18 = vld [vmem:[%s2405_s0 + $0x26] ss:$8 sm:$0xf]   ;;  %v971_v19 = vld [vmem:[%s2405_s0 + $0x7] ss:$8 sm:$0xf0]  }
   0x8   :  { %170 = vrot.lane.b32.xlu0 %v169_v11, %s1167_s14  ;;  %v966_v20 = vld [vmem:[%s2405_s0 + $0x24] ss:$8 sm:$0xf]   ;;  %v967_v21 = vld [vmem:[%s2405_s0 + $0x5] ss:$8 sm:$0xf0]   ;;  %v247_v22 = vsel %vm155_vm0, %v971_v19, %v970_v18 }
   0x9   :  { %v234_v23 = vsel %vm155_vm0, %v967_v21, %v966_v20  ;;  %v977_v24 = vld [vmem:[%s2405_s0 + $0x2] ss:$8 sm:$0xf]   ;;  %v978_v25 = vld [vmem:[%s2405_s0 - $0x1d] ss:$8 sm:$0xf0]  }
   0xa   :  { %v255_v26 = vld [vmem:[%s2405_s0] ss:$8 sm:$0xf]   ;;  %v974_v27 = vld [vmem:[%s2405_s0 - $0x1f] ss:$8 sm:$0xf0]   ;;  %v272_v28 = vsel %vm155_vm0, %v978_v25, %v977_v24 }
   0xb   :  { %222 = vrot.lane.b32.xlu1 %v221_v16, %s1167_s14  ;;  %v259_v29 = vsel %vm155_vm0, %v974_v27, %v255_v26  ;;  %v985_v30 = vld [vmem:[%s2405_s0 + $0x6] ss:$8 sm:$0xf]   ;;  %v986_v31 = vld [vmem:[%s2405_s0 - $0x19] ss:$8 sm:$0xf0]  }
   0xc   :  { %209 = vrot.lane.b32.xlu0 %v208_v17, %s1167_s14  ;;  %v981_v32 = vld [vmem:[%s2405_s0 + $0x4] ss:$8 sm:$0xf]   ;;  %v982_v33 = vld [vmem:[%s2405_s0 - $0x1b] ss:$8 sm:$0xf0]   ;;  %v298_v34 = vsel %vm155_vm0, %v986_v31, %v985_v30 }
   0xd   :  { %v285_v35 = vsel %vm155_vm0, %v982_v33, %v981_v32  ;;  %v993_v36 = vld [vmem:[%s2405_s0 + $0x22] ss:$8 sm:$0xf]   ;;  %v994_v37 = vld [vmem:[%s2405_s0 + $0x3] ss:$8 sm:$0xf0]  }
   0xe   :  { %v989_v38 = vld [vmem:[%s2405_s0 + $0x20] ss:$8 sm:$0xf]   ;;  %v990_v39 = vld [vmem:[%s2405_s0 + $0x1] ss:$8 sm:$0xf0]   ;;  %v324_v40 = vsel %vm155_vm0, %v994_v37, %v993_v36 }
   0xf   :  { %248 = vrot.lane.b32.xlu1 %v247_v22, %s1167_s14  ;;  %v311_v41 = vsel %vm155_vm0, %v990_v39, %v989_v38  ;;  %v1001_v42 = vld [vmem:[%s2405_s0 + $0x26] ss:$8 sm:$0xf]   ;;  %v1002_v43 = vld [vmem:[%s2405_s0 + $0x7] ss:$8 sm:$0xf0]  }
  0x10   :  { %235 = vrot.lane.b32.xlu0 %v234_v23, %s1167_s14  ;;  %v997_v44 = vld [vmem:[%s2405_s0 + $0x24] ss:$8 sm:$0xf]   ;;  %v998_v45 = vld [vmem:[%s2405_s0 + $0x5] ss:$8 sm:$0xf0]   ;;  %v350_v46 = vsel %vm155_vm0, %v1002_v43, %v1001_v42 }
  0x11   :  { %v337_v47 = vsel %vm155_vm0, %v998_v45, %v997_v44  ;;  %v1008_v48 = vld [vmem:[%s2405_s0 + $0x2] ss:$8 sm:$0xf]   ;;  %v1009_v49 = vld [vmem:[%s2405_s0 - $0x1d] ss:$8 sm:$0xf0]  }
  0x12   :  { %v358_v50 = vld [vmem:[%s2405_s0] ss:$8 sm:$0xf]   ;;  %v1005_v51 = vld [vmem:[%s2405_s0 - $0x1f] ss:$8 sm:$0xf0]   ;;  %v375_v52 = vsel %vm155_vm0, %v1009_v49, %v1008_v48 }
  0x13   :  { %273 = vrot.lane.b32.xlu1 %v272_v28, %s1168_s26  ;;  %v1016_v53 = vld [vmem:[%s2405_s0 + $0x6] ss:$8 sm:$0xf]   ;;  %v1017_v54 = vld [vmem:[%s2405_s0 - $0x19] ss:$8 sm:$0xf0]   ;;  %v362_v55 = vsel %vm155_vm0, %v1005_v51, %v358_v50 }
  0x14   :  { %260 = vrot.lane.b32.xlu0 %v259_v29, %s1168_s26  ;;  %v1012_v56 = vld [vmem:[%s2405_s0 + $0x4] ss:$8 sm:$0xf]   ;;  %v1013_v57 = vld [vmem:[%s2405_s0 - $0x1b] ss:$8 sm:$0xf0]   ;;  %v401_v1 = vsel %vm155_vm0, %v1017_v54, %v1016_v53 }
  0x15   :  { %v1070_v58 = vld [vmem:[%s2405_s0 + $0x2] ss:$8 sm:$0xf]   ;;  %v1071_v59 = vld [vmem:[%s2405_s0 - $0x1d] ss:$8 sm:$0xf0]   ;;  %v388_v7 = vsel %vm155_vm0, %v1013_v57, %v1012_v56 }
  0x16   :  { %s1169_s5 = smov 80   ;;  %v1024_v60 = vld [vmem:[%s2405_s0 + $0x22] ss:$8 sm:$0xf]   ;;  %v1344_v62 = vsel %vm155_vm0, %v1071_v59, %v1070_v58  ;;  %s1170_s16 = smov 64  }
  0x17   :  { %299 = vrot.lane.b32.xlu1 %v298_v34, %s1168_s26  ;;  %v1025_v61 = vld [vmem:[%s2405_s0 + $0x3] ss:$8 sm:$0xf0]   ;;  %v564_v63 = vld [vmem:[%s2405_s0] ss:$8 sm:$0xf]  }
  0x18   :  { %286 = vrot.lane.b32.xlu0 %v285_v35, %s1168_s26  ;;  %v1067_v0 = vld [vmem:[%s2405_s0 - $0x1f] ss:$8 sm:$0xf0]   ;;  %v1020_v2 = vld [vmem:[%s2405_s0 + $0x20] ss:$8 sm:$0xf]   ;;  %v427_v19 = vsel %vm155_vm0, %v1025_v61, %v1024_v60 }
  0x19   :  { %v1021_v3 = vld [vmem:[%s2405_s0 + $0x1] ss:$8 sm:$0xf0]   ;;  %v1361_v4 = vsel %vm155_vm0, %v1067_v0, %v564_v63  ;;  %v1078_v5 = vld [vmem:[%s2405_s0 + $0x6] ss:$8 sm:$0xf]  }
  0x1a   :  { %v1079_v6 = vld [vmem:[%s2405_s0 - $0x19] ss:$8 sm:$0xf0]   ;;  %v1074_v9 = vld [vmem:[%s2405_s0 + $0x4] ss:$8 sm:$0xf]   ;;  %v414_v25 = vsel %vm155_vm0, %v1021_v3, %v1020_v2 }
  0x1b   :  { %325 = vrot.lane.b32.xlu1 %v324_v40, %s1168_s26  ;;  %v1371_v8 = vsel %vm155_vm0, %v1079_v6, %v1078_v5  ;;  %v1075_v10 = vld [vmem:[%s2405_s0 - $0x1b] ss:$8 sm:$0xf0]   ;;  %v1086_v12 = vld [vmem:[%s2405_s0 + $0x22] ss:$8 sm:$0xf]  }
  0x1c   :  { %312 = vrot.lane.b32.xlu0 %v311_v41, %s1168_s26  ;;  %v1380_v11 = vsel %vm155_vm0, %v1075_v10, %v1074_v9  ;;  %v1087_v13 = vld [vmem:[%s2405_s0 + $0x3] ss:$8 sm:$0xf0]   ;;  %v1032_v14 = vld [vmem:[%s2405_s0 + $0x26] ss:$8 sm:$0xf]  }
  0x1d   :  { %v1033_v15 = vld [vmem:[%s2405_s0 + $0x7] ss:$8 sm:$0xf0]   ;;  %v1396_v16 = vsel %vm155_vm0, %v1087_v13, %v1086_v12  ;;  %v1082_v17 = vld [vmem:[%s2405_s0 + $0x20] ss:$8 sm:$0xf]  }
  0x1e   :  { %v1083_v18 = vld [vmem:[%s2405_s0 + $0x1] ss:$8 sm:$0xf0]   ;;  %v1028_v20 = vld [vmem:[%s2405_s0 + $0x24] ss:$8 sm:$0xf]   ;;  %v453_v37 = vsel %vm155_vm0, %v1033_v15, %v1032_v14 }
  0x1f   :  { %351 = vrot.lane.b32.xlu1 %v350_v46, %s1168_s26  ;;  %v1029_v21 = vld [vmem:[%s2405_s0 + $0x5] ss:$8 sm:$0xf0]   ;;  %v1413_v22 = vsel %vm155_vm0, %v1083_v18, %v1082_v17  ;;  %v1094_v23 = vld [vmem:[%s2405_s0 + $0x26] ss:$8 sm:$0xf]  }
  0x20   :  { %338 = vrot.lane.b32.xlu0 %v337_v47, %s1168_s26  ;;  %v1095_v24 = vld [vmem:[%s2405_s0 + $0x7] ss:$8 sm:$0xf0]   ;;  %v1090_v27 = vld [vmem:[%s2405_s0 + $0x24] ss:$8 sm:$0xf]   ;;  %v440_v43 = vsel %vm155_vm0, %v1029_v21, %v1028_v20 }
  0x21   :  { %v1423_v26 = vsel %vm155_vm0, %v1095_v24, %v1094_v23  ;;  %v1091_v28 = vld [vmem:[%s2405_s0 + $0x5] ss:$8 sm:$0xf0]   ;;  %v1101_v30 = vld [vmem:[%s2405_s0 + $0x2] ss:$8 sm:$0xf]  }
  0x22   :  { %v1432_v29 = vsel %vm155_vm0, %v1091_v28, %v1090_v27  ;;  %v1102_v31 = vld [vmem:[%s2405_s0 - $0x1d] ss:$8 sm:$0xf0]   ;;  %v1039_v32 = vld [vmem:[%s2405_s0 + $0x2] ss:$8 sm:$0xf]  }
  0x23   :  { %376 = vrot.lane.b32.xlu1 %v375_v52, %s1169_s5  ;;  %v1040_v33 = vld [vmem:[%s2405_s0 - $0x1d] ss:$8 sm:$0xf0]   ;;  %v1448_v34 = vsel %vm155_vm0, %v1102_v31, %v1101_v30  ;;  %v667_v35 = vld [vmem:[%s2405_s0] ss:$8 sm:$0xf]  }
  0x24   :  { %363 = vrot.lane.b32.xlu0 %v362_v55, %s1169_s5  ;;  %v1098_v36 = vld [vmem:[%s2405_s0 - $0x1f] ss:$8 sm:$0xf0]   ;;  %v461_v38 = vld [vmem:[%s2405_s0] ss:$8 sm:$0xf]   ;;  %v478_v55 = vsel %vm155_vm0, %v1040_v33, %v1039_v32 }
  0x25   :  { %v1036_v39 = vld [vmem:[%s2405_s0 - $0x1f] ss:$8 sm:$0xf0]   ;;  %v1465_v40 = vsel %vm155_vm0, %v1098_v36, %v667_v35  ;;  %v1109_v41 = vld [vmem:[%s2405_s0 + $0x6] ss:$8 sm:$0xf]  }
  0x26   :  { %v1110_v42 = vld [vmem:[%s2405_s0 - $0x19] ss:$8 sm:$0xf0]   ;;  %v1105_v45 = vld [vmem:[%s2405_s0 + $0x4] ss:$8 sm:$0xf]   ;;  %v465_v60 = vsel %vm155_vm0, %v1036_v39, %v461_v38 }
  0x27   :  { %402 = vrot.lane.b32.xlu1 %v401_v1, %s1169_s5  ;;  %v1475_v44 = vsel %vm155_vm0, %v1110_v42, %v1109_v41  ;;  %v1106_v46 = vld [vmem:[%s2405_s0 - $0x1b] ss:$8 sm:$0xf0]   ;;  %v1117_v48 = vld [vmem:[%s2405_s0 + $0x22] ss:$8 sm:$0xf]  }
  0x28   :  { %389 = vrot.lane.b32.xlu0 %v388_v7, %s1169_s5  ;;  %v1484_v47 = vsel %vm155_vm0, %v1106_v46, %v1105_v45  ;;  %v1118_v49 = vld [vmem:[%s2405_s0 + $0x3] ss:$8 sm:$0xf0]   ;;  %v1047_v50 = vld [vmem:[%s2405_s0 + $0x6] ss:$8 sm:$0xf]  }
  0x29   :  { %v1048_v51 = vld [vmem:[%s2405_s0 - $0x19] ss:$8 sm:$0xf0]   ;;  %v1500_v52 = vsel %vm155_vm0, %v1118_v49, %v1117_v48  ;;  %v1113_v53 = vld [vmem:[%s2405_s0 + $0x20] ss:$8 sm:$0xf]  }
  0x2a   :  { %v1114_v54 = vld [vmem:[%s2405_s0 + $0x1] ss:$8 sm:$0xf0]   ;;  %v1043_v56 = vld [vmem:[%s2405_s0 + $0x4] ss:$8 sm:$0xf]   ;;  %v504_v10 = vsel %vm155_vm0, %v1048_v51, %v1047_v50 }
  0x2b   :  { %428 = vrot.lane.b32.xlu1 %v427_v19, %s1169_s5  ;;  %v1514_v57 = vsel %vm155_vm0, %v1114_v54, %v1113_v53  ;;  %v1125_v58 = vld [vmem:[%s2405_s0 + $0x26] ss:$8 sm:$0xf]   ;;  %v1126_v59 = vld [vmem:[%s2405_s0 + $0x7] ss:$8 sm:$0xf0]  }
  0x2c   :  { %415 = vrot.lane.b32.xlu0 %v414_v25, %s1169_s5  ;;  %v1524_v61 = vsel %vm155_vm0, %v1126_v59, %v1125_v58  ;;  %v1121_v63 = vld [vmem:[%s2405_s0 + $0x24] ss:$8 sm:$0xf]   ;;  %v1122_v0 = vld [vmem:[%s2405_s0 + $0x5] ss:$8 sm:$0xf0]  }
  0x2d   :  { %v1044_v1 = vld [vmem:[%s2405_s0 - $0x1b] ss:$8 sm:$0xf0]   ;;  %v1536_v2 = vsel %vm155_vm0, %v1122_v0, %v1121_v63  ;;  %v1132_v3 = vld [vmem:[%s2405_s0 + $0x2] ss:$8 sm:$0xf]  }
  0x2e   :  { %v1055_v5 = vld [vmem:[%s2405_s0 + $0x22] ss:$8 sm:$0xf]   ;;  %v1056_v6 = vld [vmem:[%s2405_s0 + $0x3] ss:$8 sm:$0xf0]   ;;  %v491_v18 = vsel %vm155_vm0, %v1044_v1, %v1043_v56 }
  0x2f   :  { %454 = vrot.lane.b32.xlu1 %v453_v37, %s1169_s5  ;;  %v1133_v7 = vld [vmem:[%s2405_s0 - $0x1d] ss:$8 sm:$0xf0]   ;;  %v770_v9 = vld [vmem:[%s2405_s0] ss:$8 sm:$0xf]   ;;  %v530_v33 = vsel %vm155_vm0, %v1056_v6, %v1055_v5 }
  0x30   :  { %441 = vrot.lane.b32.xlu0 %v440_v43, %s1169_s5  ;;  %v1051_v12 = vld [vmem:[%s2405_s0 + $0x20] ss:$8 sm:$0xf]   ;;  %v1052_v13 = vld [vmem:[%s2405_s0 + $0x1] ss:$8 sm:$0xf0]   ;;  %v787_v14 = vsel %vm155_vm0, %v1133_v7, %v1132_v3 }
  0x31   :  { %v1129_v15 = vld [vmem:[%s2405_s0 - $0x1f] ss:$8 sm:$0xf0]   ;;  %v1140_v17 = vld [vmem:[%s2405_s0 + $0x6] ss:$8 sm:$0xf]   ;;  %v517_v39 = vsel %vm155_vm0, %v1052_v13, %v1051_v12 }
  0x32   :  { %v1571_v19 = vsel %vm155_vm0, %v1129_v15, %v770_v9  ;;  %v1141_v20 = vld [vmem:[%s2405_s0 - $0x19] ss:$8 sm:$0xf0]   ;;  %v1136_v21 = vld [vmem:[%s2405_s0 + $0x4] ss:$8 sm:$0xf]  }
  0x33   :  { %479 = vrot.lane.b32.xlu1 %v478_v55, %s1170_s16  ;;  %v1580_v23 = vsel %vm155_vm0, %v1141_v20, %v1140_v17  ;;  %v1137_v24 = vld [vmem:[%s2405_s0 - $0x1b] ss:$8 sm:$0xf0]   ;;  %v1148_v25 = vld [vmem:[%s2405_s0 + $0x22] ss:$8 sm:$0xf]  }
  0x34   :  { %466 = vrot.lane.b32.xlu0 %v465_v60, %s1170_s16  ;;  %v1063_v27 = vld [vmem:[%s2405_s0 + $0x26] ss:$8 sm:$0xf]   ;;  %v1064_v28 = vld [vmem:[%s2405_s0 + $0x7] ss:$8 sm:$0xf0]   ;;  %v1596_v30 = vsel %vm155_vm0, %v1137_v24, %v1136_v21 }
  0x35   :  { %v1149_v31 = vld [vmem:[%s2405_s0 + $0x3] ss:$8 sm:$0xf0]   ;;  %v1144_v32 = vld [vmem:[%s2405_s0 + $0x20] ss:$8 sm:$0xf]   ;;  %v556_v50 = vsel %vm155_vm0, %v1064_v28, %v1063_v27 }
  0x36   :  { %v1059_v35 = vld [vmem:[%s2405_s0 + $0x24] ss:$8 sm:$0xf]   ;;  %v1610_v36 = vsel %vm155_vm0, %v1149_v31, %v1148_v25  ;;  %v1145_v37 = vld [vmem:[%s2405_s0 + $0x1] ss:$8 sm:$0xf0]  }
  0x37   :  { %505 = vrot.lane.b32.xlu1 %v504_v10, %s1170_s16  ;;  %v1156_v38 = vld [vmem:[%s2405_s0 + $0x26] ss:$8 sm:$0xf]   ;;  %v1620_v41 = vsel %vm155_vm0, %v1145_v37, %v1144_v32  ;;  %v1157_v42 = vld [vmem:[%s2405_s0 + $0x7] ss:$8 sm:$0xf0]  }
  0x38   :  { %492 = vrot.lane.b32.xlu0 %v491_v18, %s1170_s16  ;;  %v1152_v43 = vld [vmem:[%s2405_s0 + $0x24] ss:$8 sm:$0xf]   ;;  %v1060_v45 = vld [vmem:[%s2405_s0 + $0x5] ss:$8 sm:$0xf0]   ;;  %v1632_v46 = vsel %vm155_vm0, %v1157_v42, %v1156_v38 }
  0x39   :  { %v1153_v48 = vld [vmem:[%s2405_s0 + $0x5] ss:$8 sm:$0xf0]   ;;  %v543_v51 = vsel %vm155_vm0, %v1060_v45, %v1059_v35  ;;  %s1172_s4 = smov 32   ;;  %s1173_s12 = smov 16  }
  0x3a   :  { %v1639_v49 = vsel %vm155_vm0, %v1153_v48, %v1152_v43 }
  0x3b   :  { %531 = vrot.lane.b32.xlu1 %v530_v33, %s1170_s16 }
  0x3c   :  { %518 = vrot.lane.b32.xlu0 %v517_v39, %s1170_s16 }
  0x3f   :  { %557 = vrot.lane.b32.xlu1 %v556_v50, %s1170_s16 }
  0x40   :  { %544 = vrot.lane.b32.xlu0 %v543_v51, %s1170_s16  ;;  %s1171_s16 = smov 48  }
  0x43   :  { %582 = vrot.lane.b32.xlu1 %v1344_v62, %s1171_s16  ;;  %v2_v62 = vld [vmem:[%s2405_s0] sm:$0xff]  }
  0x44   :  { %569 = vrot.lane.b32.xlu0 %v1361_v4, %s1171_s16  ;;  %v880_v4 = vld [vmem:[%s2405_s0 + $0x8] sm:$0xff]   ;;  %4 = vst.msk [vmem:[%s2406_s1] sm:$0x1] %vm3_vm1, %v2_v62   ;;  %873 = vst.msk [vmem:[%s2406_s1 + $0x1f] sm:$0x2] %vm3_vm1, %v2_v62  }
  0x45   :  { %874 = vst.msk [vmem:[%s2406_s1 + $0x3e] sm:$0x4] %vm3_vm1, %v2_v62   ;;  %875 = vst.msk [vmem:[%s2406_s1 + $0x5d] sm:$0x8] %vm3_vm1, %v2_v62  }
  0x46   :  { %876 = vst.msk [vmem:[%s2406_s1 + $0x7c] sm:$0x10] %vm3_vm1, %v2_v62   ;;  %877 = vst.msk [vmem:[%s2406_s1 + $0x9b] sm:$0x20] %vm3_vm1, %v2_v62  }
  0x47   :  { %608 = vrot.lane.b32.xlu1 %v1371_v8, %s1171_s16  ;;  %v889_v8 = vld [vmem:[%s2405_s0 + $0x10] sm:$0xff]   ;;  %878 = vst.msk [vmem:[%s2406_s1 + $0xba] sm:$0x40] %vm3_vm1, %v2_v62   ;;  %879 = vst.msk [vmem:[%s2406_s1 + $0xd9] sm:$0x80] %vm3_vm1, %v2_v62  }
  0x48   :  { %595 = vrot.lane.b32.xlu0 %v1380_v11, %s1171_s16  ;;  %881 = vst.msk [vmem:[%s2406_s1 + $0x8] sm:$0x1] %vm3_vm1, %v880_v4   ;;  %882 = vst.msk [vmem:[%s2406_s1 + $0x27] sm:$0x2] %vm3_vm1, %v880_v4   ;;  %v898_v11 = vld [vmem:[%s2405_s0 + $0x18] sm:$0xff]  }
  0x49   :  { %883 = vst.msk [vmem:[%s2406_s1 + $0x46] sm:$0x4] %vm3_vm1, %v880_v4   ;;  %884 = vst.msk [vmem:[%s2406_s1 + $0x65] sm:$0x8] %vm3_vm1, %v880_v4  }
  0x4a   :  { %885 = vst.msk [vmem:[%s2406_s1 + $0x84] sm:$0x10] %vm3_vm1, %v880_v4   ;;  %886 = vst.msk [vmem:[%s2406_s1 + $0xa3] sm:$0x20] %vm3_vm1, %v880_v4  }
  0x4b   :  { %634 = vrot.lane.b32.xlu1 %v1396_v16, %s1171_s16  ;;  %887 = vst.msk [vmem:[%s2406_s1 + $0xc2] sm:$0x40] %vm3_vm1, %v880_v4   ;;  %888 = vst.msk [vmem:[%s2406_s1 + $0xe1] sm:$0x80] %vm3_vm1, %v880_v4   ;;  %v907_v16 = vld [vmem:[%s2405_s0 + $0x20] sm:$0xff]  }
  0x4c   :  { %621 = vrot.lane.b32.xlu0 %v1413_v22, %s1171_s16  ;;  %890 = vst.msk [vmem:[%s2406_s1 + $0x10] sm:$0x1] %vm3_vm1, %v889_v8   ;;  %891 = vst.msk [vmem:[%s2406_s1 + $0x2f] sm:$0x2] %vm3_vm1, %v889_v8   ;;  %v916_v22 = vld [vmem:[%s2405_s0 + $0x28] sm:$0xff]  }
  0x4d   :  { %892 = vst.msk [vmem:[%s2406_s1 + $0x4e] sm:$0x4] %vm3_vm1, %v889_v8   ;;  %893 = vst.msk [vmem:[%s2406_s1 + $0x6d] sm:$0x8] %vm3_vm1, %v889_v8  }
  0x4e   :  { %894 = vst.msk [vmem:[%s2406_s1 + $0x8c] sm:$0x10] %vm3_vm1, %v889_v8   ;;  %895 = vst.msk [vmem:[%s2406_s1 + $0xab] sm:$0x20] %vm3_vm1, %v889_v8  }
  0x4f   :  { %660 = vrot.lane.b32.xlu1 %v1423_v26, %s1171_s16  ;;  %896 = vst.msk [vmem:[%s2406_s1 + $0xca] sm:$0x40] %vm3_vm1, %v889_v8   ;;  %897 = vst.msk [vmem:[%s2406_s1 + $0xe9] sm:$0x80] %vm3_vm1, %v889_v8   ;;  %v925_v26 = vld [vmem:[%s2405_s0 + $0x30] sm:$0xff]  }
  0x50   :  { %647 = vrot.lane.b32.xlu0 %v1432_v29, %s1171_s16  ;;  %899 = vst.msk [vmem:[%s2406_s1 + $0x18] sm:$0x1] %vm3_vm1, %v898_v11   ;;  %900 = vst.msk [vmem:[%s2406_s1 + $0x37] sm:$0x2] %vm3_vm1, %v898_v11   ;;  %v934_v29 = vld [vmem:[%s2405_s0 + $0x38] sm:$0xff]  }
  0x51   :  { %901 = vst.msk [vmem:[%s2406_s1 + $0x56] sm:$0x4] %vm3_vm1, %v898_v11   ;;  %902 = vst.msk [vmem:[%s2406_s1 + $0x75] sm:$0x8] %vm3_vm1, %v898_v11  }
  0x52   :  { %903 = vst.msk [vmem:[%s2406_s1 + $0x94] sm:$0x10] %vm3_vm1, %v898_v11   ;;  %904 = vst.msk [vmem:[%s2406_s1 + $0xb3] sm:$0x20] %vm3_vm1, %v898_v11  }
  0x53   :  { %685 = vrot.lane.b32.xlu1 %v1448_v34, %s1172_s4  ;;  %905 = vst.msk [vmem:[%s2406_s1 + $0xd2] sm:$0x40] %vm3_vm1, %v898_v11   ;;  %906 = vst.msk [vmem:[%s2406_s1 + $0xf1] sm:$0x80] %vm3_vm1, %v898_v11  }
  0x54   :  { %672 = vrot.lane.b32.xlu0 %v1465_v40, %s1172_s4  ;;  %908 = vst.msk [vmem:[%s2406_s1 + $0x100] sm:$0x1] %vm3_vm1, %v907_v16   ;;  %909 = vst.msk [vmem:[%s2406_s1 + $0x11f] sm:$0x2] %vm3_vm1, %v907_v16  }
  0x55   :  { %910 = vst.msk [vmem:[%s2406_s1 + $0x13e] sm:$0x4] %vm3_vm1, %v907_v16   ;;  %911 = vst.msk [vmem:[%s2406_s1 + $0x15d] sm:$0x8] %vm3_vm1, %v907_v16  }
  0x56   :  { %912 = vst.msk [vmem:[%s2406_s1 + $0x17c] sm:$0x10] %vm3_vm1, %v907_v16   ;;  %913 = vst.msk [vmem:[%s2406_s1 + $0x19b] sm:$0x20] %vm3_vm1, %v907_v16  }
  0x57   :  { %711 = vrot.lane.b32.xlu1 %v1475_v44, %s1172_s4  ;;  %914 = vst.msk [vmem:[%s2406_s1 + $0x1ba] sm:$0x40] %vm3_vm1, %v907_v16   ;;  %915 = vst.msk [vmem:[%s2406_s1 + $0x1d9] sm:$0x80] %vm3_vm1, %v907_v16  }
  0x58   :  { %698 = vrot.lane.b32.xlu0 %v1484_v47, %s1172_s4  ;;  %917 = vst.msk [vmem:[%s2406_s1 + $0x108] sm:$0x1] %vm3_vm1, %v916_v22   ;;  %918 = vst.msk [vmem:[%s2406_s1 + $0x127] sm:$0x2] %vm3_vm1, %v916_v22  }
  0x59   :  { %919 = vst.msk [vmem:[%s2406_s1 + $0x146] sm:$0x4] %vm3_vm1, %v916_v22   ;;  %920 = vst.msk [vmem:[%s2406_s1 + $0x165] sm:$0x8] %vm3_vm1, %v916_v22  }
  0x5a   :  { %921 = vst.msk [vmem:[%s2406_s1 + $0x184] sm:$0x10] %vm3_vm1, %v916_v22   ;;  %922 = vst.msk [vmem:[%s2406_s1 + $0x1a3] sm:$0x20] %vm3_vm1, %v916_v22  }
  0x5b   :  { %737 = vrot.lane.b32.xlu1 %v1500_v52, %s1172_s4  ;;  %923 = vst.msk [vmem:[%s2406_s1 + $0x1c2] sm:$0x40] %vm3_vm1, %v916_v22   ;;  %924 = vst.msk [vmem:[%s2406_s1 + $0x1e1] sm:$0x80] %vm3_vm1, %v916_v22  }
  0x5c   :  { %724 = vrot.lane.b32.xlu0 %v1514_v57, %s1172_s4  ;;  %926 = vst.msk [vmem:[%s2406_s1 + $0x110] sm:$0x1] %vm3_vm1, %v925_v26   ;;  %927 = vst.msk [vmem:[%s2406_s1 + $0x12f] sm:$0x2] %vm3_vm1, %v925_v26  }
  0x5d   :  { %928 = vst.msk [vmem:[%s2406_s1 + $0x14e] sm:$0x4] %vm3_vm1, %v925_v26   ;;  %929 = vst.msk [vmem:[%s2406_s1 + $0x16d] sm:$0x8] %vm3_vm1, %v925_v26  }
  0x5e   :  { %930 = vst.msk [vmem:[%s2406_s1 + $0x18c] sm:$0x10] %vm3_vm1, %v925_v26   ;;  %931 = vst.msk [vmem:[%s2406_s1 + $0x1ab] sm:$0x20] %vm3_vm1, %v925_v26  }
  0x5f   :  { %763 = vrot.lane.b32.xlu1 %v1524_v61, %s1172_s4  ;;  %932 = vst.msk [vmem:[%s2406_s1 + $0x1ca] sm:$0x40] %vm3_vm1, %v925_v26   ;;  %933 = vst.msk [vmem:[%s2406_s1 + $0x1e9] sm:$0x80] %vm3_vm1, %v925_v26  }
  0x60   :  { %750 = vrot.lane.b32.xlu0 %v1536_v2, %s1172_s4  ;;  %935 = vst.msk [vmem:[%s2406_s1 + $0x118] sm:$0x1] %vm3_vm1, %v934_v29   ;;  %936 = vst.msk [vmem:[%s2406_s1 + $0x137] sm:$0x2] %vm3_vm1, %v934_v29  }
  0x61   :  { %937 = vst.msk [vmem:[%s2406_s1 + $0x156] sm:$0x4] %vm3_vm1, %v934_v29   ;;  %938 = vst.msk [vmem:[%s2406_s1 + $0x175] sm:$0x8] %vm3_vm1, %v934_v29  }
  0x62   :  { %939 = vst.msk [vmem:[%s2406_s1 + $0x194] sm:$0x10] %vm3_vm1, %v934_v29   ;;  %940 = vst.msk [vmem:[%s2406_s1 + $0x1b3] sm:$0x20] %vm3_vm1, %v934_v29  }
  0x63   :  { %788 = vrot.lane.b32.xlu1 %v787_v14, %s1173_s12  ;;  %941 = vst.msk [vmem:[%s2406_s1 + $0x1d2] sm:$0x40] %vm3_vm1, %v934_v29   ;;  %942 = vst.msk [vmem:[%s2406_s1 + $0x1f1] sm:$0x80] %vm3_vm1, %v934_v29  }
  0x64   :  { %775 = vrot.lane.b32.xlu0 %v1571_v19, %s1173_s12 }
  0x67   :  { %814 = vrot.lane.b32.xlu1 %v1580_v23, %s1173_s12 }
  0x68   :  { %801 = vrot.lane.b32.xlu0 %v1596_v30, %s1173_s12 }
  0x6b   :  { %840 = vrot.lane.b32.xlu1 %v1610_v36, %s1173_s12 }
  0x6c   :  { %827 = vrot.lane.b32.xlu0 %v1620_v41, %s1173_s12 }
  0x6f   :  { %866 = vrot.lane.b32.xlu1 %v1632_v46, %s1173_s12 }
  0x70   :  { %853 = vrot.lane.b32.xlu0 %v1639_v49, %s1173_s12 }
  0x75   :  { %v184_v34 = vpop.permute.xlu1 %183  }
  0x76   :  { %952 = vst.msk [vmem:[%s2406_s1 + $0x81] ss:$8 sm:$0xf] %vm3_vm1, %v184_v34   ;;  %953 = vst.msk [vmem:[%s2406_s1 + $0x81] ss:$8 sm:$0xf0] %vm3_vm1, %v184_v34   ;;  %v158_v40 = vpop.permute.xlu0 %157  }
  0x77   :  { %944 = vst.msk [vmem:[%s2406_s1 + $0x1] ss:$8 sm:$0xf] %vm3_vm1, %v158_v40   ;;  %945 = vst.msk [vmem:[%s2406_s1 + $0x1] ss:$8 sm:$0xf0] %vm3_vm1, %v158_v40  }
  0x79   :  { %v197_v44 = vpop.permute.xlu1 %196  }
  0x7a   :  { %956 = vst.msk [vmem:[%s2406_s1 + $0xc1] ss:$8 sm:$0xf] %vm3_vm1, %v197_v44   ;;  %957 = vst.msk [vmem:[%s2406_s1 + $0xc1] ss:$8 sm:$0xf0] %vm3_vm1, %v197_v44   ;;  %v171_v47 = vpop.permute.xlu0 %170  }
  0x7b   :  { %948 = vst.msk [vmem:[%s2406_s1 + $0x41] ss:$8 sm:$0xf] %vm3_vm1, %v171_v47   ;;  %949 = vst.msk [vmem:[%s2406_s1 + $0x41] ss:$8 sm:$0xf0] %vm3_vm1, %v171_v47  }
  0x7d   :  { %v223_v52 = vpop.permute.xlu1 %222  }
  0x7e   :  { %964 = vst.msk [vmem:[%s2406_s1 + $0x141] ss:$8 sm:$0xf] %vm3_vm1, %v223_v52   ;;  %965 = vst.msk [vmem:[%s2406_s1 + $0x141] ss:$8 sm:$0xf0] %vm3_vm1, %v223_v52   ;;  %v210_v53 = vpop.permute.xlu0 %209  }
  0x7f   :  { %960 = vst.msk [vmem:[%s2406_s1 + $0x101] ss:$8 sm:$0xf] %vm3_vm1, %v210_v53   ;;  %961 = vst.msk [vmem:[%s2406_s1 + $0x101] ss:$8 sm:$0xf0] %vm3_vm1, %v210_v53  }
  0x81   :  { %v249_v54 = vpop.permute.xlu1 %248  }
  0x82   :  { %972 = vst.msk [vmem:[%s2406_s1 + $0x1c1] ss:$8 sm:$0xf] %vm3_vm1, %v249_v54   ;;  %973 = vst.msk [vmem:[%s2406_s1 + $0x1c1] ss:$8 sm:$0xf0] %vm3_vm1, %v249_v54   ;;  %v236_v55 = vpop.permute.xlu0 %235  }
  0x83   :  { %968 = vst.msk [vmem:[%s2406_s1 + $0x181] ss:$8 sm:$0xf] %vm3_vm1, %v236_v55   ;;  %969 = vst.msk [vmem:[%s2406_s1 + $0x181] ss:$8 sm:$0xf0] %vm3_vm1, %v236_v55  }
  0x85   :  { %v274_v56 = vpop.permute.xlu1 %273  }
  0x86   :  { %979 = vst.msk [vmem:[%s2406_s1 + $0x42] ss:$8 sm:$0xf] %vm3_vm1, %v274_v56   ;;  %980 = vst.msk [vmem:[%s2406_s1 + $0x42] ss:$8 sm:$0xf0] %vm3_vm1, %v274_v56   ;;  %v261_v57 = vpop.permute.xlu0 %260  }
  0x87   :  { %975 = vst.msk [vmem:[%s2406_s1 + $0x2] ss:$8 sm:$0xf] %vm3_vm1, %v261_v57   ;;  %976 = vst.msk [vmem:[%s2406_s1 + $0x2] ss:$8 sm:$0xf0] %vm3_vm1, %v261_v57  }
  0x89   :  { %v300_v58 = vpop.permute.xlu1 %299  }
  0x8a   :  { %987 = vst.msk [vmem:[%s2406_s1 + $0xc2] ss:$8 sm:$0xf] %vm3_vm1, %v300_v58   ;;  %988 = vst.msk [vmem:[%s2406_s1 + $0xc2] ss:$8 sm:$0xf0] %vm3_vm1, %v300_v58   ;;  %v287_v59 = vpop.permute.xlu0 %286  }
  0x8b   :  { %983 = vst.msk [vmem:[%s2406_s1 + $0x82] ss:$8 sm:$0xf] %vm3_vm1, %v287_v59   ;;  %984 = vst.msk [vmem:[%s2406_s1 + $0x82] ss:$8 sm:$0xf0] %vm3_vm1, %v287_v59  }
  0x8d   :  { %v326_v60 = vpop.permute.xlu1 %325  }
  0x8e   :  { %995 = vst.msk [vmem:[%s2406_s1 + $0x142] ss:$8 sm:$0xf] %vm3_vm1, %v326_v60   ;;  %996 = vst.msk [vmem:[%s2406_s1 + $0x142] ss:$8 sm:$0xf0] %vm3_vm1, %v326_v60   ;;  %v313_v61 = vpop.permute.xlu0 %312  }
  0x8f   :  { %991 = vst.msk [vmem:[%s2406_s1 + $0x102] ss:$8 sm:$0xf] %vm3_vm1, %v313_v61   ;;  %992 = vst.msk [vmem:[%s2406_s1 + $0x102] ss:$8 sm:$0xf0] %vm3_vm1, %v313_v61  }
  0x91   :  { %v352_v63 = vpop.permute.xlu1 %351  }
  0x92   :  { %1003 = vst.msk [vmem:[%s2406_s1 + $0x1c2] ss:$8 sm:$0xf] %vm3_vm1, %v352_v63   ;;  %1004 = vst.msk [vmem:[%s2406_s1 + $0x1c2] ss:$8 sm:$0xf0] %vm3_vm1, %v352_v63   ;;  %v339_v0 = vpop.permute.xlu0 %338  }
  0x93   :  { %999 = vst.msk [vmem:[%s2406_s1 + $0x182] ss:$8 sm:$0xf] %vm3_vm1, %v339_v0   ;;  %1000 = vst.msk [vmem:[%s2406_s1 + $0x182] ss:$8 sm:$0xf0] %vm3_vm1, %v339_v0  }
  0x95   :  { %v377_v1 = vpop.permute.xlu1 %376  }
  0x96   :  { %1010 = vst.msk [vmem:[%s2406_s1 + $0x43] ss:$8 sm:$0xf] %vm3_vm1, %v377_v1   ;;  %1011 = vst.msk [vmem:[%s2406_s1 + $0x43] ss:$8 sm:$0xf0] %vm3_vm1, %v377_v1   ;;  %v364_v2 = vpop.permute.xlu0 %363  }
  0x97   :  { %1006 = vst.msk [vmem:[%s2406_s1 + $0x3] ss:$8 sm:$0xf] %vm3_vm1, %v364_v2   ;;  %1007 = vst.msk [vmem:[%s2406_s1 + $0x3] ss:$8 sm:$0xf0] %vm3_vm1, %v364_v2  }
  0x99   :  { %v403_v3 = vpop.permute.xlu1 %402  }
  0x9a   :  { %1018 = vst.msk [vmem:[%s2406_s1 + $0xc3] ss:$8 sm:$0xf] %vm3_vm1, %v403_v3   ;;  %1019 = vst.msk [vmem:[%s2406_s1 + $0xc3] ss:$8 sm:$0xf0] %vm3_vm1, %v403_v3   ;;  %v390_v5 = vpop.permute.xlu0 %389  }
  0x9b   :  { %1014 = vst.msk [vmem:[%s2406_s1 + $0x83] ss:$8 sm:$0xf] %vm3_vm1, %v390_v5   ;;  %1015 = vst.msk [vmem:[%s2406_s1 + $0x83] ss:$8 sm:$0xf0] %vm3_vm1, %v390_v5  }
  0x9d   :  { %v429_v6 = vpop.permute.xlu1 %428  }
  0x9e   :  { %1026 = vst.msk [vmem:[%s2406_s1 + $0x143] ss:$8 sm:$0xf] %vm3_vm1, %v429_v6   ;;  %1027 = vst.msk [vmem:[%s2406_s1 + $0x143] ss:$8 sm:$0xf0] %vm3_vm1, %v429_v6   ;;  %v416_v7 = vpop.permute.xlu0 %415  }
  0x9f   :  { %1022 = vst.msk [vmem:[%s2406_s1 + $0x103] ss:$8 sm:$0xf] %vm3_vm1, %v416_v7   ;;  %1023 = vst.msk [vmem:[%s2406_s1 + $0x103] ss:$8 sm:$0xf0] %vm3_vm1, %v416_v7  }
  0xa1   :  { %v455_v9 = vpop.permute.xlu1 %454  }
  0xa2   :  { %1034 = vst.msk [vmem:[%s2406_s1 + $0x1c3] ss:$8 sm:$0xf] %vm3_vm1, %v455_v9   ;;  %1035 = vst.msk [vmem:[%s2406_s1 + $0x1c3] ss:$8 sm:$0xf0] %vm3_vm1, %v455_v9   ;;  %v442_v10 = vpop.permute.xlu0 %441  }
  0xa3   :  { %1030 = vst.msk [vmem:[%s2406_s1 + $0x183] ss:$8 sm:$0xf] %vm3_vm1, %v442_v10   ;;  %1031 = vst.msk [vmem:[%s2406_s1 + $0x183] ss:$8 sm:$0xf0] %vm3_vm1, %v442_v10  }
  0xa5   :  { %v480_v12 = vpop.permute.xlu1 %479  }
  0xa6   :  { %1041 = vst.msk [vmem:[%s2406_s1 + $0x44] ss:$8 sm:$0xf] %vm3_vm1, %v480_v12   ;;  %1042 = vst.msk [vmem:[%s2406_s1 + $0x44] ss:$8 sm:$0xf0] %vm3_vm1, %v480_v12   ;;  %v467_v13 = vpop.permute.xlu0 %466  }
  0xa7   :  { %1037 = vst.msk [vmem:[%s2406_s1 + $0x4] ss:$8 sm:$0xf] %vm3_vm1, %v467_v13   ;;  %1038 = vst.msk [vmem:[%s2406_s1 + $0x4] ss:$8 sm:$0xf0] %vm3_vm1, %v467_v13  }
  0xa9   :  { %v506_v14 = vpop.permute.xlu1 %505  }
  0xaa   :  { %1049 = vst.msk [vmem:[%s2406_s1 + $0xc4] ss:$8 sm:$0xf] %vm3_vm1, %v506_v14   ;;  %1050 = vst.msk [vmem:[%s2406_s1 + $0xc4] ss:$8 sm:$0xf0] %vm3_vm1, %v506_v14   ;;  %v493_v15 = vpop.permute.xlu0 %492  }
  0xab   :  { %1045 = vst.msk [vmem:[%s2406_s1 + $0x84] ss:$8 sm:$0xf] %vm3_vm1, %v493_v15   ;;  %1046 = vst.msk [vmem:[%s2406_s1 + $0x84] ss:$8 sm:$0xf0] %vm3_vm1, %v493_v15  }
  0xad   :  { %v532_v17 = vpop.permute.xlu1 %531  }
  0xae   :  { %1057 = vst.msk [vmem:[%s2406_s1 + $0x144] ss:$8 sm:$0xf] %vm3_vm1, %v532_v17   ;;  %1058 = vst.msk [vmem:[%s2406_s1 + $0x144] ss:$8 sm:$0xf0] %vm3_vm1, %v532_v17   ;;  %v519_v18 = vpop.permute.xlu0 %518  }
  0xaf   :  { %1053 = vst.msk [vmem:[%s2406_s1 + $0x104] ss:$8 sm:$0xf] %vm3_vm1, %v519_v18   ;;  %1054 = vst.msk [vmem:[%s2406_s1 + $0x104] ss:$8 sm:$0xf0] %vm3_vm1, %v519_v18  }
  0xb1   :  { %v558_v19 = vpop.permute.xlu1 %557  }
  0xb2   :  { %1065 = vst.msk [vmem:[%s2406_s1 + $0x1c4] ss:$8 sm:$0xf] %vm3_vm1, %v558_v19   ;;  %1066 = vst.msk [vmem:[%s2406_s1 + $0x1c4] ss:$8 sm:$0xf0] %vm3_vm1, %v558_v19   ;;  %v545_v20 = vpop.permute.xlu0 %544  }
  0xb3   :  { %1061 = vst.msk [vmem:[%s2406_s1 + $0x184] ss:$8 sm:$0xf] %vm3_vm1, %v545_v20   ;;  %1062 = vst.msk [vmem:[%s2406_s1 + $0x184] ss:$8 sm:$0xf0] %vm3_vm1, %v545_v20  }
  0xb5   :  { %v583_v21 = vpop.permute.xlu1 %582  }
  0xb6   :  { %1072 = vst.msk [vmem:[%s2406_s1 + $0x45] ss:$8 sm:$0xf] %vm3_vm1, %v583_v21   ;;  %1073 = vst.msk [vmem:[%s2406_s1 + $0x45] ss:$8 sm:$0xf0] %vm3_vm1, %v583_v21   ;;  %v570_v23 = vpop.permute.xlu0 %569  }
  0xb7   :  { %1068 = vst.msk [vmem:[%s2406_s1 + $0x5] ss:$8 sm:$0xf] %vm3_vm1, %v570_v23   ;;  %1069 = vst.msk [vmem:[%s2406_s1 + $0x5] ss:$8 sm:$0xf0] %vm3_vm1, %v570_v23  }
  0xb9   :  { %v609_v24 = vpop.permute.xlu1 %608  }
  0xba   :  { %1080 = vst.msk [vmem:[%s2406_s1 + $0xc5] ss:$8 sm:$0xf] %vm3_vm1, %v609_v24   ;;  %1081 = vst.msk [vmem:[%s2406_s1 + $0xc5] ss:$8 sm:$0xf0] %vm3_vm1, %v609_v24   ;;  %v596_v25 = vpop.permute.xlu0 %595  }
  0xbb   :  { %1076 = vst.msk [vmem:[%s2406_s1 + $0x85] ss:$8 sm:$0xf] %vm3_vm1, %v596_v25   ;;  %1077 = vst.msk [vmem:[%s2406_s1 + $0x85] ss:$8 sm:$0xf0] %vm3_vm1, %v596_v25  }
  0xbd   :  { %v635_v27 = vpop.permute.xlu1 %634  }
  0xbe   :  { %1088 = vst.msk [vmem:[%s2406_s1 + $0x145] ss:$8 sm:$0xf] %vm3_vm1, %v635_v27   ;;  %1089 = vst.msk [vmem:[%s2406_s1 + $0x145] ss:$8 sm:$0xf0] %vm3_vm1, %v635_v27   ;;  %v622_v28 = vpop.permute.xlu0 %621  }
  0xbf   :  { %1084 = vst.msk [vmem:[%s2406_s1 + $0x105] ss:$8 sm:$0xf] %vm3_vm1, %v622_v28   ;;  %1085 = vst.msk [vmem:[%s2406_s1 + $0x105] ss:$8 sm:$0xf0] %vm3_vm1, %v622_v28  }
  0xc1   :  { %v661_v30 = vpop.permute.xlu1 %660  }
  0xc2   :  { %1096 = vst.msk [vmem:[%s2406_s1 + $0x1c5] ss:$8 sm:$0xf] %vm3_vm1, %v661_v30   ;;  %1097 = vst.msk [vmem:[%s2406_s1 + $0x1c5] ss:$8 sm:$0xf0] %vm3_vm1, %v661_v30   ;;  %v648_v31 = vpop.permute.xlu0 %647  }
  0xc3   :  { %1092 = vst.msk [vmem:[%s2406_s1 + $0x185] ss:$8 sm:$0xf] %vm3_vm1, %v648_v31   ;;  %1093 = vst.msk [vmem:[%s2406_s1 + $0x185] ss:$8 sm:$0xf0] %vm3_vm1, %v648_v31  }
  0xc5   :  { %v686_v32 = vpop.permute.xlu1 %685  }
  0xc6   :  { %1103 = vst.msk [vmem:[%s2406_s1 + $0x46] ss:$8 sm:$0xf] %vm3_vm1, %v686_v32   ;;  %1104 = vst.msk [vmem:[%s2406_s1 + $0x46] ss:$8 sm:$0xf0] %vm3_vm1, %v686_v32   ;;  %v673_v33 = vpop.permute.xlu0 %672  }
  0xc7   :  { %1099 = vst.msk [vmem:[%s2406_s1 + $0x6] ss:$8 sm:$0xf] %vm3_vm1, %v673_v33   ;;  %1100 = vst.msk [vmem:[%s2406_s1 + $0x6] ss:$8 sm:$0xf0] %vm3_vm1, %v673_v33  }
  0xc9   :  { %v712_v35 = vpop.permute.xlu1 %711  }
  0xca   :  { %1111 = vst.msk [vmem:[%s2406_s1 + $0xc6] ss:$8 sm:$0xf] %vm3_vm1, %v712_v35   ;;  %1112 = vst.msk [vmem:[%s2406_s1 + $0xc6] ss:$8 sm:$0xf0] %vm3_vm1, %v712_v35   ;;  %v699_v36 = vpop.permute.xlu0 %698  }
  0xcb   :  { %1107 = vst.msk [vmem:[%s2406_s1 + $0x86] ss:$8 sm:$0xf] %vm3_vm1, %v699_v36   ;;  %1108 = vst.msk [vmem:[%s2406_s1 + $0x86] ss:$8 sm:$0xf0] %vm3_vm1, %v699_v36  }
  0xcd   :  { %v738_v37 = vpop.permute.xlu1 %737  }
  0xce   :  { %1119 = vst.msk [vmem:[%s2406_s1 + $0x146] ss:$8 sm:$0xf] %vm3_vm1, %v738_v37   ;;  %1120 = vst.msk [vmem:[%s2406_s1 + $0x146] ss:$8 sm:$0xf0] %vm3_vm1, %v738_v37   ;;  %v725_v38 = vpop.permute.xlu0 %724  }
  0xcf   :  { %1115 = vst.msk [vmem:[%s2406_s1 + $0x106] ss:$8 sm:$0xf] %vm3_vm1, %v725_v38   ;;  %1116 = vst.msk [vmem:[%s2406_s1 + $0x106] ss:$8 sm:$0xf0] %vm3_vm1, %v725_v38  }
  0xd1   :  { %v764_v39 = vpop.permute.xlu1 %763  }
  0xd2   :  { %1127 = vst.msk [vmem:[%s2406_s1 + $0x1c6] ss:$8 sm:$0xf] %vm3_vm1, %v764_v39   ;;  %1128 = vst.msk [vmem:[%s2406_s1 + $0x1c6] ss:$8 sm:$0xf0] %vm3_vm1, %v764_v39   ;;  %v751_v41 = vpop.permute.xlu0 %750  }
  0xd3   :  { %1123 = vst.msk [vmem:[%s2406_s1 + $0x186] ss:$8 sm:$0xf] %vm3_vm1, %v751_v41   ;;  %1124 = vst.msk [vmem:[%s2406_s1 + $0x186] ss:$8 sm:$0xf0] %vm3_vm1, %v751_v41  }
  0xd5   :  { %v789_v42 = vpop.permute.xlu1 %788  }
  0xd6   :  { %1134 = vst.msk [vmem:[%s2406_s1 + $0x47] ss:$8 sm:$0xf] %vm3_vm1, %v789_v42   ;;  %1135 = vst.msk [vmem:[%s2406_s1 + $0x47] ss:$8 sm:$0xf0] %vm3_vm1, %v789_v42   ;;  %v776_v43 = vpop.permute.xlu0 %775  }
  0xd7   :  { %1130 = vst.msk [vmem:[%s2406_s1 + $0x7] ss:$8 sm:$0xf] %vm3_vm1, %v776_v43   ;;  %1131 = vst.msk [vmem:[%s2406_s1 + $0x7] ss:$8 sm:$0xf0] %vm3_vm1, %v776_v43  }
  0xd9   :  { %v815_v45 = vpop.permute.xlu1 %814  }
  0xda   :  { %1142 = vst.msk [vmem:[%s2406_s1 + $0xc7] ss:$8 sm:$0xf] %vm3_vm1, %v815_v45   ;;  %1143 = vst.msk [vmem:[%s2406_s1 + $0xc7] ss:$8 sm:$0xf0] %vm3_vm1, %v815_v45   ;;  %v802_v46 = vpop.permute.xlu0 %801  }
  0xdb   :  { %1138 = vst.msk [vmem:[%s2406_s1 + $0x87] ss:$8 sm:$0xf] %vm3_vm1, %v802_v46   ;;  %1139 = vst.msk [vmem:[%s2406_s1 + $0x87] ss:$8 sm:$0xf0] %vm3_vm1, %v802_v46  }
  0xdd   :  { %v841_v48 = vpop.permute.xlu1 %840  }
  0xde   :  { %1150 = vst.msk [vmem:[%s2406_s1 + $0x147] ss:$8 sm:$0xf] %vm3_vm1, %v841_v48   ;;  %1151 = vst.msk [vmem:[%s2406_s1 + $0x147] ss:$8 sm:$0xf0] %vm3_vm1, %v841_v48   ;;  %v828_v49 = vpop.permute.xlu0 %827  }
  0xdf   :  { %1146 = vst.msk [vmem:[%s2406_s1 + $0x107] ss:$8 sm:$0xf] %vm3_vm1, %v828_v49   ;;  %1147 = vst.msk [vmem:[%s2406_s1 + $0x107] ss:$8 sm:$0xf0] %vm3_vm1, %v828_v49  }
  0xe1   :  { %v867_v50 = vpop.permute.xlu1 %866  }
  0xe2   :  { %1158 = vst.msk [vmem:[%s2406_s1 + $0x1c7] ss:$8 sm:$0xf] %vm3_vm1, %v867_v50   ;;  %1159 = vst.msk [vmem:[%s2406_s1 + $0x1c7] ss:$8 sm:$0xf0] %vm3_vm1, %v867_v50   ;;  %v854_v51 = vpop.permute.xlu0 %853  }
  0xe3   :  { %1154 = vst.msk [vmem:[%s2406_s1 + $0x187] ss:$8 sm:$0xf] %vm3_vm1, %v854_v51   ;;  %1155 = vst.msk [vmem:[%s2406_s1 + $0x187] ss:$8 sm:$0xf0] %vm3_vm1, %v854_v51  }

// kernel: _forward.1
= control target key start
LH: loop header
LB: loop body
LE: loop exit
PB: predicated region body
PF: predicated region fallthrough
CT: control target
= control target key end

     0   :  { %s1022_s18 = smov 0   ;;  %s1097_s0 = inlined_call_operand.vmem [shape: bf16[5,72,512], index: 0, kind: input, shape index: {}]   ;;  %s1098_s1 = inlined_call_operand.vmem [shape: bf16[5,32,512], index: 1, kind: input, shape index: {}]   ;;  %s1099_s2 = inlined_call_operand.vmem [shape: bf16[5,32,72], index: 2, kind: input, shape index: {}]   ;;  %s1100_s3 = inlined_call_operand.vmem [shape: f32[5,32,1], index: 3, kind: input, shape index: {}]   ;;  %s1101_s4 = inlined_call_operand.vmem [shape: bf16[5,16,64], index: 4, kind: input, shape index: {}]   ;;  %s1102_s5 = inlined_call_operand.vmem [shape: f32[5,16,512], index: 5, kind: output, shape index: {}]  }
   0x1 LB: > { %s866_s19 = sadd.s32 4294967295, %s989_s18   ;;  %p870_p0 = scmp.ge.s32.totalorder %s989_s18, 1  ;;  %s989_s18 = sphi %s1022_s18, %s15_s18  }
   0x2   : > { %p227_p1 = scmp.lt.s32.totalorder %s989_s18, 6 }
   0x4   : > { %p228_p2 = pnand %p870_p0, %p227_p1 }
   0x5   : > { %p275_p3 = scmp.lt.s32.totalorder (!%p228_p2), %s866_s19, 4 }
   0x6   : > { %231 = sbr.rel (%p228_p2) target bundleno = 461 (0x1cd), region = 40 }
   0xb   : > { %v991_v0 = vmov 0   ;;  %s1104_s19 = smov (!%p275_p3, %s866_s19), 4  ;;  %vm459_vm0 = vcmask 1043456   ;;  %vm452_vm1 = vcmask 588800   ;;  %vm657_vm2 = vcmask 523264  }
   0xc   : > { %504 = vmatprep.mubr.bf16.mxu0 %v991_v0  ;;  %557 = vmatprep.mubr.bf16.mxu1 %v991_v0  ;;  %s928_s20 = smul.u32 144, %s1104_s19  ;;  %s924_s21 = sshll.u32 %s1104_s19, 4 }
   0xd   : > { %939 = vset.pattern.permute.xlu1 %v991_v0  ;;  %938 = vset.pattern.permute.xlu0 %v991_v0  ;;  %s1041_s24 = scalar_lea.vmem %s1099_s2, %s924_s21  ;;  %s925_s28 = sshll.u32 %s1104_s19, 5 }
   0xe   : > { %s1046_s27 = scalar_lea.vmem %s1097_s0, %s928_s20  ;;  %s294_s6 = scalar_lea.vmem %s1100_s3, %s925_s28  ;;  %v968_v29 = vld [vmem:[%s1041_s24] sm:$0xff]   ;;  %v969_v30 = vld [vmem:[%s1041_s24 + $0x8] sm:$0xff]  }
   0xf   : > { %v326_v1 = vld [vmem:[%s1046_s27 + $0x80] sm:$0xff]  ;;  %v327_v2 = vld [vmem:[%s1046_s27 + $0x88] sm:$0xff]  ;;  %v330_v24 = vld [vmem:[%s294_s6 + $0x10] sm:$0xff]  ;;  %s923_s7 = sshll.u32 %s1104_s19, 6  ;;  %s926_s11 = sshll.u32 %s1104_s19, 3 }
  0x10   : > { %v901_v3 = vcombine.high %v326_v1, %v326_v1  ;;  %v903_v4 = vcombine.high %v327_v2, %v327_v2  ;;  %v900_v5 = vcombine.low %v326_v1, %v326_v1  ;;  %v902_v6 = vcombine.low %v327_v2, %v327_v2  ;;  %v944_v7 = vld [vmem:[%s1046_s27 + $0x64] ss:$16 sps:$4 sm:$0xff]   ;;  %v946_v8 = vld [vmem:[%s1046_s27 + $0x6c] ss:$16 sps:$4 sm:$0xff]   ;;  %v948_v11 = vld [vmem:[%s1046_s27 + $0x60] ss:$16 sps:$4 sm:$0xff]   ;;  %344 = vperm.xlu0 %938, %v330_v24   ;;  %s284_s10 = scalar_lea.vmem %s1098_s1, %s923_s7  ;;  %s1086_s14 = scalar_lea.vmem %s1101_s4, %s926_s11 }
  0x11   : > { %v949_v12 = vld [vmem:[%s1046_s27 + $0x68] ss:$16 sps:$4 sm:$0xff]   ;;  %v950_v13 = vld [vmem:[%s1046_s27 + $0x44] ss:$16 sps:$4 sm:$0xff]   ;;  %v952_v14 = vld [vmem:[%s1046_s27 + $0x4c] ss:$16 sps:$4 sm:$0xff]   ;;  %s304_s17 = scalar_lea.vmem %s1102_s5, %s923_s7 }
  0x12   : > { %904 = vmatprep.subr.msk.bf16.mxu0 %vm459_vm0, %v901_v3  ;;  %907 = vmatprep.subr.msk.bf16.mxu1 %vm459_vm0, %v903_v4  ;;  %v461_v9 = vsel %vm459_vm0, %v900_v5, 0  ;;  %v467_v10 = vsel %vm459_vm0, %v902_v6, 0  ;;  %v954_v15 = vld [vmem:[%s1046_s27 + $0x40] ss:$16 sps:$4 sm:$0xff]   ;;  %v955_v16 = vld [vmem:[%s1046_s27 + $0x48] ss:$16 sps:$4 sm:$0xff]  }
  0x13   : > { %479 = vmatpush1.bf16.msra.mxu0 %v461_v9  ;;  %532 = vmatpush1.bf16.msra.mxu1 %v467_v10  ;;  %v956_v17 = vld [vmem:[%s1046_s27 + $0x24] ss:$16 sps:$4 sm:$0xff]   ;;  %v958_v18 = vld [vmem:[%s1046_s27 + $0x2c] ss:$16 sps:$4 sm:$0xff]   ;;  %v960_v19 = vld [vmem:[%s1046_s27 + $0x20] ss:$16 sps:$4 sm:$0xff]  }
  0x14   : > { %480 = vmatprep.subr.bf16.mxu0 %v944_v7  ;;  %533 = vmatprep.subr.bf16.mxu1 %v946_v8  ;;  %v961_v20 = vld [vmem:[%s1046_s27 + $0x28] ss:$16 sps:$4 sm:$0xff]   ;;  %v328_v21 = vld [vmem:[%s294_s6] sm:$0xff]  ;;  %v964_v23 = vld [vmem:[%s1046_s27 + $0xc] ss:$16 sps:$4 sm:$0xff]  }
  0x15   : > { %v962_v22 = vld [vmem:[%s1046_s27 + $0x4] ss:$16 sps:$4 sm:$0xff]   ;;  %334 = vperm.xlu1 %939, %v328_v21   ;;  %v329_v25 = vld [vmem:[%s294_s6 + $0x8] sm:$0xff]  ;;  %v331_v26 = vld [vmem:[%s294_s6 + $0x18] sm:$0xff] }
  0x16   : > { %v966_v27 = vld [vmem:[%s1046_s27] ss:$16 sps:$4 sm:$0xff]   ;;  %v967_v28 = vld [vmem:[%s1046_s27 + $0x8] ss:$16 sps:$4 sm:$0xff]   ;;  %349 = vperm.xlu0 %938, %v331_v26   ;;  %v972_v31 = vld [vmem:[%s284_s10 + $0x24] ss:$16 sps:$4 sm:$0xff]  }
  0x17   : > { %481 = vmatpush1.bf16.msra.mxu0 %v948_v11  ;;  %534 = vmatpush1.bf16.msra.mxu1 %v949_v12  ;;  %v970_v32 = vld [vmem:[%s284_s10 + $0x20] ss:$16 sps:$4 sm:$0xff]   ;;  %v973_v33 = vld [vmem:[%s284_s10 + $0x28] ss:$16 sps:$4 sm:$0xff]   ;;  %v975_v34 = vld [vmem:[%s284_s10 + $0x2c] ss:$16 sps:$4 sm:$0xff]  }
  0x18   : > { %482 = vmatprep.subr.bf16.mxu0 %v950_v13  ;;  %535 = vmatprep.subr.bf16.mxu1 %v952_v14  ;;  %v978_v35 = vld [vmem:[%s284_s10 + $0x4] ss:$16 sps:$4 sm:$0xff]   ;;  %v981_v36 = vld [vmem:[%s284_s10 + $0xc] ss:$16 sps:$4 sm:$0xff]   ;;  %v976_v37 = vld [vmem:[%s284_s10] ss:$16 sps:$4 sm:$0xff]  }
  0x19   : > { %339 = vperm.xlu1 %939, %v329_v25   ;;  %v979_v38 = vld [vmem:[%s284_s10 + $0x8] ss:$16 sps:$4 sm:$0xff]  }
  0x1b   : > { %483 = vmatpush1.bf16.msra.mxu0 %v954_v15  ;;  %536 = vmatpush1.bf16.msra.mxu1 %v955_v16 }
  0x1c   : > { %484 = vmatprep.subr.bf16.mxu0 %v956_v17  ;;  %537 = vmatprep.subr.bf16.mxu1 %v958_v18 }
  0x1f   : > { %485 = vmatpush1.bf16.msra.mxu0 %v960_v19  ;;  %538 = vmatpush1.bf16.msra.mxu1 %v961_v20 }
  0x20   : > { %486 = vmatprep.subr.bf16.mxu0 %v962_v22  ;;  %539 = vmatprep.subr.bf16.mxu1 %v964_v23 }
  0x23   : > { %487 = vmatpush1.bf16.msra.mxu0 %v966_v27  ;;  %540 = vmatpush1.bf16.msra.mxu1 %v967_v28 }
  0x24   : > { %669 = vmatprep.subr.bf16.mxu0 %v972_v31  ;;  %712 = vmatprep.subr.bf16.mxu1 %v975_v34 }
  0x26   : > { %905 = vmatmul.mubr.msk.bf16.vlgmr.msra.gmra.mxu0 %vm452_vm1, %v968_v29  ;;  %908 = vmatmul.mubr.msk.bf16.vlgmr.msra.gmra.mxu1 %vm452_vm1, %v968_v29 }
  0x27   : > { %514 = vmatprep.mubr.bf16.mxu0 %v991_v0  ;;  %567 = vmatprep.mubr.bf16.mxu1 %v991_v0 }
  0x28   : > { %670 = vmatpush1.bf16.msra.mxu0 %v970_v32  ;;  %713 = vmatpush1.bf16.msra.mxu1 %v973_v33 }
  0x29   : > { %671 = vmatprep.subr.bf16.mxu0 %v978_v35  ;;  %714 = vmatprep.subr.bf16.mxu1 %v981_v36  ;;  %v982_v35 = vld [vmem:[%s1086_s14] sm:$0xff]  }
  0x2c   : > { %672 = vmatpush1.bf16.msra.mxu0 %v976_v37  ;;  %715 = vmatpush1.bf16.msra.mxu1 %v979_v38 }
  0x2e   : > { %906 = vmatmul.mubr.msk.bf16.gmra.mxu0 %vm452_vm1, %v969_v30  ;;  %909 = vmatmul.mubr.msk.bf16.gmra.mxu1 %vm452_vm1, %v969_v30 }
  0x2f   : > { %693 = vmatprep.mubr.bf16.mxu0 %v991_v0  ;;  %736 = vmatprep.mubr.bf16.mxu1 %v991_v0 }
  0x8b   : > { %v345_v46 = vpop.permute.xlu0 %344 }
  0x90   : > { %v335_v45 = vpop.permute.xlu1 %334 }
  0x91   : > { %v350_v54 = vpop.permute.xlu0 %349 }
  0x94   : > { %v340_v53 = vpop.permute.xlu1 %339 }
  0xe6   : > { %v506_v39 = vpop.f32.mrf.mxu0  ;;  %v559_v40 = vpop.f32.mrf.mxu1 }
  0xe7   : > { %v507_v17 = vadd.f32 %v506_v39, %v335_v45  ;;  %v560_v18 = vadd.f32 %v559_v40, %v335_v45 }
  0xe8   : > { %v508_v41 = vpop.f32.mrf.mxu0  ;;  %v561_v42 = vpop.f32.mrf.mxu1 }
  0xe9   : > { %v509_v63 = vadd.f32 %v508_v41, %v335_v45  ;;  %v562_v0 = vadd.f32 %v561_v42, %v335_v45  ;;  %v578_v31 = vmax.f32 %v507_v17, 0.0  ;;  %v580_v32 = vmax.f32 %v560_v18, 0.0 }
  0xea   : > { %v510_v43 = vpop.f32.mrf.mxu0  ;;  %v563_v44 = vpop.f32.mrf.mxu1 }
  0xeb   : > { %v511_v5 = vadd.f32 %v510_v43, %v340_v53  ;;  %v564_v6 = vadd.f32 %v563_v44, %v340_v53  ;;  %v579_v21 = vmax.f32 %v509_v63, 0.0  ;;  %v581_v22 = vmax.f32 %v562_v0, 0.0 }
  0xec   : > { %v512_v47 = vpop.f32.mrf.mxu0  ;;  %v565_v48 = vpop.f32.mrf.mxu1 }
  0xed   : > { %v513_v55 = vadd.f32 %v512_v47, %v340_v53  ;;  %v566_v56 = vadd.f32 %v565_v48, %v340_v53  ;;  %v582_v25 = vmax.f32 %v511_v5, 0.0  ;;  %v584_v26 = vmax.f32 %v564_v6, 0.0 }
  0xee   : > { %v516_v49 = vpop.f32.mrf.mxu0  ;;  %v569_v50 = vpop.f32.mrf.mxu1 }
  0xef   : > { %v517_v1 = vadd.f32 %v516_v49, %v345_v46  ;;  %v570_v2 = vadd.f32 %v569_v50, %v345_v46  ;;  %v583_v9 = vmax.f32 %v513_v55, 0.0  ;;  %v585_v10 = vmax.f32 %v566_v56, 0.0 }
  0xf0   : > { %v518_v51 = vpop.f32.mrf.mxu0  ;;  %v571_v52 = vpop.f32.mrf.mxu1  ;;  %v594_v33 = vpack.c.bf16 %v582_v25, %v578_v31  ;;  %v596_v34 = vpack.c.bf16 %v584_v26, %v580_v32 }
  0xf1   : > { %v519_v59 = vadd.f32 %v518_v51, %v345_v46  ;;  %v572_v60 = vadd.f32 %v571_v52, %v345_v46  ;;  %v586_v19 = vmax.f32 %v517_v1, 0.0  ;;  %v588_v20 = vmax.f32 %v570_v2, 0.0 }
  0xf2   : > { %v520_v57 = vpop.f32.mrf.mxu0  ;;  %v573_v58 = vpop.f32.mrf.mxu1  ;;  %v595_v29 = vpack.c.bf16 %v583_v9, %v579_v21  ;;  %v597_v30 = vpack.c.bf16 %v585_v10, %v581_v22 }
  0xf3   : > { %v521_v61 = vadd.f32 %v520_v57, %v350_v54  ;;  %v574_v62 = vadd.f32 %v573_v58, %v350_v54  ;;  %v587_v13 = vmax.f32 %v519_v59, 0.0  ;;  %v589_v14 = vmax.f32 %v572_v60, 0.0 }
  0xf4   : > { %v522_v3 = vpop.f32.mrf.mxu0  ;;  %v575_v4 = vpop.f32.mrf.mxu1 }
  0xf5   : > { %v523_v7 = vadd.f32 %v522_v3, %v350_v54  ;;  %v576_v8 = vadd.f32 %v575_v4, %v350_v54  ;;  %v590_v11 = vmax.f32 %v521_v61, 0.0  ;;  %v592_v12 = vmax.f32 %v574_v62, 0.0 }
  0xf7   : > { %v591_v15 = vmax.f32 %v523_v7, 0.0  ;;  %v593_v16 = vmax.f32 %v576_v8, 0.0  ;;  %v598_v27 = vpack.c.bf16 %v590_v11, %v586_v19  ;;  %v600_v28 = vpack.c.bf16 %v592_v12, %v588_v20 }
  0xf9   : > { %v599_v23 = vpack.c.bf16 %v591_v15, %v587_v13  ;;  %v601_v24 = vpack.c.bf16 %v593_v16, %v589_v14 }
  0xfb   : > { %673 = vmatprep.subr.bf16.mxu0 %v599_v23  ;;  %716 = vmatprep.subr.bf16.mxu1 %v601_v24 }
  0xfc   : > { %674 = vmatpush1.bf16.msra.mxu0 %v598_v27  ;;  %717 = vmatpush1.bf16.msra.mxu1 %v600_v28 }
  0xfd   : > { %675 = vmatprep.subr.bf16.mxu0 %v595_v29  ;;  %718 = vmatprep.subr.bf16.mxu1 %v597_v30 }
 0x100   : > { %676 = vmatpush1.bf16.msra.mxu0 %v594_v33  ;;  %719 = vmatpush1.bf16.msra.mxu1 %v596_v34 }
 0x103   : > { %919 = vmatmul.mubr.msk.bf16.vlgmr.msra.gmra.mxu0 %vm657_vm2, %v982_v35  ;;  %920 = vmatmul.mubr.msk.bf16.vlgmr.msra.gmra.mxu1 %vm657_vm2, %v982_v35 }
 0x1c3   : > { %v695_v36 = vpop.f32.mrf.mxu0  ;;  %v738_v37 = vpop.f32.mrf.mxu1 }
 0x1c4   : > { %v747_v38 = vmax.f32 %v695_v36, 0.0  ;;  %v749_v39 = vmax.f32 %v738_v37, 0.0 }
 0x1c5   : > { %v697_v40 = vpop.f32.mrf.mxu0  ;;  %v740_v41 = vpop.f32.mrf.mxu1 }
 0x1c6   : > { %755 = vst [vmem:[%s304_s17] sm:$0xff] %v747_v38  ;;  %757 = vst [vmem:[%s304_s17 + $0x10] sm:$0xff] %v749_v39  ;;  %v748_v42 = vmax.f32 %v697_v40, 0.0  ;;  %v750_v43 = vmax.f32 %v740_v41, 0.0 }
 0x1c7   : > { %v699_v44 = vpop.f32.mrf.mxu0  ;;  %v742_v45 = vpop.f32.mrf.mxu1 }
 0x1c8   : > { %756 = vst [vmem:[%s304_s17 + $0x8] sm:$0xff] %v748_v42  ;;  %758 = vst [vmem:[%s304_s17 + $0x18] sm:$0xff] %v750_v43  ;;  %v751_v46 = vmax.f32 %v699_v44, 0.0  ;;  %v753_v47 = vmax.f32 %v742_v45, 0.0 }
 0x1c9   : > { %v701_v48 = vpop.f32.mrf.mxu0  ;;  %v744_v49 = vpop.f32.mrf.mxu1 }
 0x1ca   : > { %759 = vst [vmem:[%s304_s17 + $0x20] sm:$0xff] %v751_v46  ;;  %761 = vst [vmem:[%s304_s17 + $0x30] sm:$0xff] %v753_v47  ;;  %v752_v50 = vmax.f32 %v701_v48, 0.0  ;;  %v754_v51 = vmax.f32 %v744_v49, 0.0 }
 0x1cc   : > { %760 = vst [vmem:[%s304_s17 + $0x28] sm:$0xff] %v752_v50  ;;  %762 = vst [vmem:[%s304_s17 + $0x38] sm:$0xff] %v754_v51 }
 0x1cd PF: > { %s15_s18 = sadd.s32 1, %s989_s18  }
 0x1ce   : > { %p12_p4 = scmp.ge.s32.totalorder %s15_s18, 7  }
 0x1d0   :  { %14 = sbr.rel (!%p12_p4) target bundleno = 1 (0x1), region = 82 }

</bundles_post_ra>
